<compile_context>
chip_gen: v6e
topology: v6e:2x2x1
jax: 0.10.0
libtpu: 0.0.40
codegen_flags: <defaults>
</compile_context>

<pallas_src>
import jax
import jax.numpy as jnp
from jax.experimental import pallas as pl
from jax.experimental.pallas import tpu as pltpu

CLAMP_MIN = 5.0   # module's self.min
CLAMP_MAX = 1.0   # module's self.max


def _clamp(v):
    # torch.clamp_min then torch.clamp_max (min > max here, the second wins).
    return jnp.minimum(jnp.maximum(v, CLAMP_MIN), CLAMP_MAX)


def fused_mlp_kernel(x_ref, w1_ref, b1_ref, w2_ref, b2_ref, w3_ref, b3_ref,
                     o_ref):
    # x_ref: (Cin, TILE_M)  -- lane-dense spatial dim on lanes.
    x = x_ref[...].astype(jnp.bfloat16)

    h1 = jnp.dot(w1_ref[...], x, preferred_element_type=jnp.float32)
    h1 = _clamp(h1 + b1_ref[...])                               # (40, TILE_M)

    h2 = jnp.dot(w2_ref[...], h1.astype(jnp.bfloat16),
                 preferred_element_type=jnp.float32)
    h2 = _clamp(h2 + b2_ref[...])                               # (80, TILE_M)

    h3 = jnp.dot(w3_ref[...], h2.astype(jnp.bfloat16),
                 preferred_element_type=jnp.float32)
    h3 = _clamp(h3 + b3_ref[...])                               # (10, TILE_M)

    o_ref[...] = h3.astype(o_ref.dtype)


def _pick_tile(hw):
    # Largest lane-aligned tile that divides H*W; fall back to the full
    # extent (satisfies the "block equals full array dim" rule for small HW).
    for cand in (4096, 2048, 1024, 512, 256, 128):
        if hw % cand == 0:
            return cand
    return hw


def model_forward(x_nchw, params):
    """x_nchw: (N, 10, H, W) float32  ->  (N, 10, H, W) float32."""
    w1, b1, w2, b2, w3, b3 = params
    N, C, H, W = x_nchw.shape
    HW = H * W
    cout = w3.shape[0]

    x3 = x_nchw.reshape(N, C, HW)          # free reshape, stays NCHW-native
    tile = _pick_tile(HW)
    grid = (N, HW // tile)

    out = pl.pallas_call(
        fused_mlp_kernel,
        out_shape=jax.ShapeDtypeStruct((N, cout, HW), jnp.float32),
        grid_spec=pltpu.PrefetchScalarGridSpec(
            num_scalar_prefetch=0,
            grid=grid,
            in_specs=[
                # batch dim squeezed out; kernel sees (C, tile)
                pl.BlockSpec((None, C, tile), lambda n, m: (n, 0, m)),
                # weights / biases: constant block -> resident across grid
                pl.BlockSpec(w1.shape, lambda n, m: (0, 0)),
                pl.BlockSpec(b1.shape, lambda n, m: (0, 0)),
                pl.BlockSpec(w2.shape, lambda n, m: (0, 0)),
                pl.BlockSpec(b2.shape, lambda n, m: (0, 0)),
                pl.BlockSpec(w3.shape, lambda n, m: (0, 0)),
                pl.BlockSpec(b3.shape, lambda n, m: (0, 0)),
            ],
            out_specs=pl.BlockSpec((None, cout, tile), lambda n, m: (n, 0, m)),
        ),
        compiler_params=pltpu.CompilerParams(
            dimension_semantics=("parallel", "parallel")),
    )(x3, w1, b1, w2, b2, w3, b3)

    return out.reshape(N, cout, H, W)


def init_params(key):
    """Deterministic weights.  1x1 conv weight (Cout, Cin, 1, 1) stored as a
    (Cout, Cin) matmul weight in bf16 (MXU-native); bias as (Cout, 1) f32."""
    ks = jax.random.split(key, 6)

    def conv_init(kw, kb, cin, cout):
        # mimic PyTorch Conv2d default init: U(-1/sqrt(fan_in), 1/sqrt(fan_in))
        bound = 1.0 / jnp.sqrt(float(cin))
        w = jax.random.uniform(kw, (cout, cin), jnp.float32, -bound, bound)
        b = jax.random.uniform(kb, (cout, 1), jnp.float32, -bound, bound)
        return w.astype(jnp.bfloat16), b

    w1, b1 = conv_init(ks[0], ks[1], 10, 40)
    w2, b2 = conv_init(ks[2], ks[3], 40, 80)
    w3, b3 = conv_init(ks[4], ks[5], 80, 10)
    return (w1, b1, w2, b2, w3, b3)


def reference_forward(x_nchw, params):
    """Pure-JAX reference (f32 math on the same stored weights)."""
    w1, b1, w2, b2, w3, b3 = params
    N, C, H, W = x_nchw.shape
    x = x_nchw.reshape(N, C, H * W)

    def layer(h, w, b):
        y = jnp.einsum('oc,ncm->nom', w.astype(jnp.float32), h) + b
        return _clamp(y)

    h = layer(x, w1, b1)
    h = layer(h, w2, b2)
    h = layer(h, w3, b3)
    return h.reshape(N, -1, H, W)


if __name__ == "__main__":
    key = jax.random.PRNGKey(0)
    k_params, k_x = jax.random.split(key)

    params = init_params(k_params)
    # Small input consistent with the module: N=2, C_in=10, H=W=16 (HW=256).
    x = jax.random.normal(k_x, (2, 10, 16, 16), dtype=jnp.float32)

    out = model_forward(x, params)
    out = jax.block_until_ready(out)

    ref = reference_forward(x, params)
    assert out.shape == (2, 10, 16, 16), out.shape
    assert jnp.allclose(out, ref, atol=1e-5, rtol=1e-5), "mismatch vs reference"

    print("KERNEL_OK")
</pallas_src>

<mosaic_0001>
module attributes {stable_mosaic.version = 11 : i64} {
  func.func @fused_mlp_kernel(%arg0: i32, %arg1: i32, %arg2: memref<1x10x256xf32, #tpu.memory_space<vmem>>, %arg3: memref<40x10xbf16, #tpu.memory_space<vmem>>, %arg4: memref<40x1xf32, #tpu.memory_space<vmem>>, %arg5: memref<80x40xbf16, #tpu.memory_space<vmem>>, %arg6: memref<80x1xf32, #tpu.memory_space<vmem>>, %arg7: memref<10x80xbf16, #tpu.memory_space<vmem>>, %arg8: memref<10x1xf32, #tpu.memory_space<vmem>>, %arg9: memref<1x10x256xf32, #tpu.memory_space<vmem>>) attributes {dimension_semantics = [#tpu.dimension_semantics<parallel>, #tpu.dimension_semantics<parallel>], iteration_bounds = array<i64: 2, 1>, scalar_prefetch = 0 : i64, scratch_operands = 0 : i64, tpu.core_type = #tpu.core_type<tc>, window_params = [{transform_indices = @transform_0, window_bounds = array<i64: 1, 10, 256>}, {pipeline_mode = #tpu.pipeline_mode<synchronous>, transform_indices = @transform_1, window_bounds = array<i64: 40, 10>}, {pipeline_mode = #tpu.pipeline_mode<synchronous>, transform_indices = @transform_2, window_bounds = array<i64: 40, 1>}, {pipeline_mode = #tpu.pipeline_mode<synchronous>, transform_indices = @transform_3, window_bounds = array<i64: 80, 40>}, {pipeline_mode = #tpu.pipeline_mode<synchronous>, transform_indices = @transform_4, window_bounds = array<i64: 80, 1>}, {pipeline_mode = #tpu.pipeline_mode<synchronous>, transform_indices = @transform_5, window_bounds = array<i64: 10, 80>}, {pipeline_mode = #tpu.pipeline_mode<synchronous>, transform_indices = @transform_6, window_bounds = array<i64: 10, 1>}, {transform_indices = @transform_7, window_bounds = array<i64: 1, 10, 256>}]} {
    %c0 = arith.constant 0 : index
    %c0_0 = arith.constant 0 : index
    %c0_1 = arith.constant 0 : index
    %0 = vector.load %arg2[%c0, %c0_0, %c0_1] : memref<1x10x256xf32, #tpu.memory_space<vmem>>, vector<1x10x256xf32>
    %1 = vector.shape_cast %0 : vector<1x10x256xf32> to vector<10x256xf32>
    %2 = arith.truncf %1 : vector<10x256xf32> to vector<10x256xbf16>
    %c0_2 = arith.constant 0 : index
    %c0_3 = arith.constant 0 : index
    %3 = vector.load %arg3[%c0_2, %c0_3] : memref<40x10xbf16, #tpu.memory_space<vmem>>, vector<40x10xbf16>
    %cst = arith.constant dense<0.000000e+00> : vector<40x256xf32>
    %4 = tpu.matmul %3, %2, %cst {dimension_numbers = #tpu.dot_dimension_numbers<[1], [0], [0], [1], [0, 0, 1, 1], [], []>} : vector<40x10xbf16>, vector<10x256xbf16>, vector<40x256xf32> -> vector<40x256xf32>
    %c0_4 = arith.constant 0 : index
    %c0_5 = arith.constant 0 : index
    %5 = vector.load %arg4[%c0_4, %c0_5] : memref<40x1xf32, #tpu.memory_space<vmem>>, vector<40x1xf32>
    %6 = vector.broadcast %5 : vector<40x1xf32> to vector<40x256xf32>
    %7 = arith.addf %4, %6 : vector<40x256xf32>
    %cst_6 = arith.constant 5.000000e+00 : f32
    %8 = vector.broadcast %cst_6 : f32 to vector<40x256xf32>
    %9 = arith.maximumf %7, %8 : vector<40x256xf32>
    %cst_7 = arith.constant 1.000000e+00 : f32
    %10 = vector.broadcast %cst_7 : f32 to vector<40x256xf32>
    %11 = arith.minimumf %9, %10 : vector<40x256xf32>
    %c0_8 = arith.constant 0 : index
    %c0_9 = arith.constant 0 : index
    %12 = vector.load %arg5[%c0_8, %c0_9] : memref<80x40xbf16, #tpu.memory_space<vmem>>, vector<80x40xbf16>
    %13 = arith.truncf %11 : vector<40x256xf32> to vector<40x256xbf16>
    %cst_10 = arith.constant dense<0.000000e+00> : vector<80x256xf32>
    %14 = tpu.matmul %12, %13, %cst_10 {dimension_numbers = #tpu.dot_dimension_numbers<[1], [0], [0], [1], [0, 0, 1, 1], [], []>} : vector<80x40xbf16>, vector<40x256xbf16>, vector<80x256xf32> -> vector<80x256xf32>
    %c0_11 = arith.constant 0 : index
    %c0_12 = arith.constant 0 : index
    %15 = vector.load %arg6[%c0_11, %c0_12] : memref<80x1xf32, #tpu.memory_space<vmem>>, vector<80x1xf32>
    %16 = vector.broadcast %15 : vector<80x1xf32> to vector<80x256xf32>
    %17 = arith.addf %14, %16 : vector<80x256xf32>
    %cst_13 = arith.constant 5.000000e+00 : f32
    %18 = vector.broadcast %cst_13 : f32 to vector<80x256xf32>
    %19 = arith.maximumf %17, %18 : vector<80x256xf32>
    %cst_14 = arith.constant 1.000000e+00 : f32
    %20 = vector.broadcast %cst_14 : f32 to vector<80x256xf32>
    %21 = arith.minimumf %19, %20 : vector<80x256xf32>
    %c0_15 = arith.constant 0 : index
    %c0_16 = arith.constant 0 : index
    %22 = vector.load %arg7[%c0_15, %c0_16] : memref<10x80xbf16, #tpu.memory_space<vmem>>, vector<10x80xbf16>
    %23 = arith.truncf %21 : vector<80x256xf32> to vector<80x256xbf16>
    %cst_17 = arith.constant dense<0.000000e+00> : vector<10x256xf32>
    %24 = tpu.matmul %22, %23, %cst_17 {dimension_numbers = #tpu.dot_dimension_numbers<[1], [0], [0], [1], [0, 0, 1, 1], [], []>} : vector<10x80xbf16>, vector<80x256xbf16>, vector<10x256xf32> -> vector<10x256xf32>
    %c0_18 = arith.constant 0 : index
    %c0_19 = arith.constant 0 : index
    %25 = vector.load %arg8[%c0_18, %c0_19] : memref<10x1xf32, #tpu.memory_space<vmem>>, vector<10x1xf32>
    %26 = vector.broadcast %25 : vector<10x1xf32> to vector<10x256xf32>
    %27 = arith.addf %24, %26 : vector<10x256xf32>
    %cst_20 = arith.constant 5.000000e+00 : f32
    %28 = vector.broadcast %cst_20 : f32 to vector<10x256xf32>
    %29 = arith.maximumf %27, %28 : vector<10x256xf32>
    %cst_21 = arith.constant 1.000000e+00 : f32
    %30 = vector.broadcast %cst_21 : f32 to vector<10x256xf32>
    %31 = arith.minimumf %29, %30 : vector<10x256xf32>
    %c0_22 = arith.constant 0 : index
    %c0_23 = arith.constant 0 : index
    %c0_24 = arith.constant 0 : index
    %32 = vector.load %arg9[%c0_22, %c0_23, %c0_24] : memref<1x10x256xf32, #tpu.memory_space<vmem>>, vector<1x10x256xf32>
    %33 = vector.shape_cast %32 : vector<1x10x256xf32> to vector<10x256xf32>
    %34 = vector.shape_cast %31 : vector<10x256xf32> to vector<1x10x256xf32>
    tpu.vector_store %arg9[%c0_22, %c0_23, %c0_24], %34 {strides = array<i32>} : memref<1x10x256xf32, #tpu.memory_space<vmem>>, vector<1x10x256xf32>,
    return
  }
  func.func @transform_0(%arg0: i32, %arg1: i32) -> (i32, i32, i32) {
    %c0_i32 = arith.constant 0 : i32
    %c0_i32_0 = arith.constant 0 : i32
    return %arg0, %c0_i32, %arg1 : i32, i32, i32
  }
  func.func @transform_1(%arg0: i32, %arg1: i32) -> (i32, i32) {
    %c0_i32 = arith.constant 0 : i32
    %c0_i32_0 = arith.constant 0 : i32
    %c0_i32_1 = arith.constant 0 : i32
    return %c0_i32, %c0_i32_0 : i32, i32
  }
  func.func @transform_2(%arg0: i32, %arg1: i32) -> (i32, i32) {
    %c0_i32 = arith.constant 0 : i32
    %c0_i32_0 = arith.constant 0 : i32
    %c0_i32_1 = arith.constant 0 : i32
    return %c0_i32, %c0_i32_0 : i32, i32
  }
  func.func @transform_3(%arg0: i32, %arg1: i32) -> (i32, i32) {
    %c0_i32 = arith.constant 0 : i32
    %c0_i32_0 = arith.constant 0 : i32
    %c0_i32_1 = arith.constant 0 : i32
    return %c0_i32, %c0_i32_0 : i32, i32
  }
  func.func @transform_4(%arg0: i32, %arg1: i32) -> (i32, i32) {
    %c0_i32 = arith.constant 0 : i32
    %c0_i32_0 = arith.constant 0 : i32
    %c0_i32_1 = arith.constant 0 : i32
    return %c0_i32, %c0_i32_0 : i32, i32
  }
  func.func @transform_5(%arg0: i32, %arg1: i32) -> (i32, i32) {
    %c0_i32 = arith.constant 0 : i32
    %c0_i32_0 = arith.constant 0 : i32
    %c0_i32_1 = arith.constant 0 : i32
    return %c0_i32, %c0_i32_0 : i32, i32
  }
  func.func @transform_6(%arg0: i32, %arg1: i32) -> (i32, i32) {
    %c0_i32 = arith.constant 0 : i32
    %c0_i32_0 = arith.constant 0 : i32
    %c0_i32_1 = arith.constant 0 : i32
    return %c0_i32, %c0_i32_0 : i32, i32
  }
  func.func @transform_7(%arg0: i32, %arg1: i32) -> (i32, i32, i32) {
    %c0_i32 = arith.constant 0 : i32
    %c0_i32_0 = arith.constant 0 : i32
    return %arg0, %c0_i32, %arg1 : i32, i32, i32
  }
}

</mosaic_0001>

<bundles_post_ra>
// kernel: tpu_custom_call.1
= control target key start
LH: loop header
LB: loop body
LE: loop exit
PB: predicated region body
PF: predicated region fallthrough
CT: control target
= control target key end

     0   :  { %s1027_s24 = smov 0   ;;  %s1029_s25 = smov 0   ;;  %s1171_s0 = inlined_call_operand.vmem [shape: f32[2,10,256], index: 0, kind: input, shape index: {}]   ;;  %s1172_s1 = inlined_call_operand.vmem [shape: bf16[40,10], index: 1, kind: input, shape index: {}]   ;;  %s1173_s2 = inlined_call_operand.vmem [shape: f32[40,1], index: 2, kind: input, shape index: {}]   ;;  %s1174_s3 = inlined_call_operand.vmem [shape: bf16[80,40], index: 3, kind: input, shape index: {}]   ;;  %s1175_s4 = inlined_call_operand.vmem [shape: f32[80,1], index: 4, kind: input, shape index: {}]   ;;  %s1176_s5 = inlined_call_operand.vmem [shape: bf16[10,80], index: 5, kind: input, shape index: {}]   ;;  %s1177_s6 = inlined_call_operand.vmem [shape: f32[10,1], index: 6, kind: input, shape index: {}]   ;;  %s1178_s7 = inlined_call_operand.vmem [shape: f32[2,10,256], index: 7, kind: output, shape index: {}]  }
   0x1   :  { %s1031_s26 = smov 0  }
   0x2 LB: > { %s29_s27 = sadd.s32 1, %s980_s25  ;;  %p897_p0 = scmp.ge.s32.totalorder %s984_s26, 1  ;;  %s984_s26 = sphi %s1031_s26, %s17_s26   ;;  %s980_s25 = sphi %s1029_s25, %s1180_s25   ;;  %s976_s24 = sphi %s1027_s24, %s1179_s24  }
   0x3   : > { %p31_p1 = scmp.ge.s32.totalorder %s29_s27, 2  ;;  %p258_p2 = scmp.lt.s32.totalorder %s984_s26, 3 }
   0x5   : > { %s1182_s27 = smov (%p31_p1, %s29_s27), 0  ;;  %p259_p3 = pnand %p897_p0, %p258_p2 }
   0x6   : > { %p299_p4 = scmp.lt.s32.totalorder (!%p259_p3), %s976_s24, 1 }
   0x7   : > { %262 = sbr.rel (%p259_p3) target bundleno = 720 (0x2d0), region = 48 }
   0xc   : > { %v986_v0 = vmov 0   ;;  %s1184_s24 = smov (!%p299_p4, %s976_s24), 1  ;;  %v334_v1 = vld [vmem:[%s1173_s2 + $0x20] sm:$0xff]  ;;  %v333_v2 = vld [vmem:[%s1173_s2 + $0x18] sm:$0xff]  ;;  %v332_v3 = vld [vmem:[%s1173_s2 + $0x10] sm:$0xff]  ;;  %vm383_vm0 = vcmask 1044480  }
   0xd   : > { %422 = vmatprep.mubr.bf16.mxu0 %v986_v0  ;;  %951 = vset.pattern.permute.xlu0 %v986_v0  ;;  %s924_s9 = sshll.u32 %s1184_s24, 5  ;;  %v330_v4 = vld [vmem:[%s1173_s2] sm:$0xff]  ;;  %v331_v11 = vld [vmem:[%s1173_s2 + $0x8] sm:$0xff]  ;;  %vm373_vm1 = vcmask 80896   ;;  %v493_v16 = vld [vmem:[%s1175_s4 + $0x30] sm:$0xff]  ;;  %vm588_vm2 = vcmask 1043456  }
   0xe   : > { %952 = vset.pattern.permute.xlu1 %v986_v0  ;;  %627 = vmatprep.mubr.bf16.mxu1 %v986_v0  ;;  %s306_s14 = scalar_lea.vmem %s1171_s0, %s924_s9  ;;  %v953_v12 = vld [vmem:[%s1172_s1] sm:$0xff]   ;;  %v496_v15 = vld [vmem:[%s1175_s4 + $0x48] sm:$0xff]  ;;  %v494_v17 = vld [vmem:[%s1175_s4 + $0x38] sm:$0xff]  ;;  %vm572_vm3 = vcmask 326656   ;;  %vm747_vm4 = vcmask 654336   ;;  %s316_s8 = scalar_lea.vmem %s1178_s7, %s924_s9 }
   0xf   : > { %357 = vperm.xlu0 %951, %v334_v1   ;;  %352 = vperm.xlu1 %952, %v333_v2   ;;  %v320_v5 = vld [vmem:[%s306_s14 + $0x8] sm:$0xff]  ;;  %v322_v6 = vld [vmem:[%s306_s14 + $0x18] sm:$0x3]  ;;  %v319_v7 = vld [vmem:[%s306_s14] sm:$0xff] }
  0x10   : > { %v324_v8 = vpack.c.bf16 %v322_v6, %v320_v5  ;;  %v321_v9 = vld [vmem:[%s306_s14 + $0x10] sm:$0x3]  ;;  %v495_v13 = vld [vmem:[%s1175_s4 + $0x40] sm:$0xff]  ;;  %v954_v19 = vld [vmem:[%s1172_s1 + $0x8] sm:$0xff]  }
  0x11   : > { %v323_v10 = vpack.c.bf16 %v321_v9, %v319_v7  ;;  %v491_v18 = vld [vmem:[%s1175_s4 + $0x20] sm:$0xff]  ;;  %v492_v20 = vld [vmem:[%s1175_s4 + $0x28] sm:$0xff]  ;;  %v489_v21 = vld [vmem:[%s1175_s4 + $0x10] sm:$0xff] }
  0x12   : > { %905 = vmatprep.subr.msk.bf16.mxu0 %vm383_vm0, %v324_v8  ;;  %v490_v22 = vld [vmem:[%s1175_s4 + $0x18] sm:$0xff]  ;;  %v487_v23 = vld [vmem:[%s1175_s4] sm:$0xff]  ;;  %v955_v24 = vld [vmem:[%s1172_s1 + $0x10] ss:$0 sps:$4 sm:$0xff]  }
  0x13   : > { %347 = vperm.xlu0 %951, %v332_v3   ;;  %337 = vperm.xlu1 %952, %v330_v4   ;;  %v385_v14 = vsel %vm383_vm0, %v323_v10, 0  ;;  %v488_v25 = vld [vmem:[%s1175_s4 + $0x8] sm:$0xff]  ;;  %v730_v26 = vld [vmem:[%s1177_s6] sm:$0xff] }
  0x14   : > { %405 = vmatpush1.bf16.msra.mxu0 %v385_v14  ;;  %v731_v27 = vld [vmem:[%s1177_s6 + $0x8] sm:$0x3] }
  0x17   : > { %342 = vperm.xlu0 %951, %v331_v11   ;;  %539 = vperm.xlu1 %952, %v495_v13  }
  0x18   : > { %906 = vmatmul.mubr.msk.bf16.vlgmr.msra.gmra.mxu0 %vm373_vm1, %v953_v12 }
  0x19   : > { %432 = vmatprep.mubr.bf16.mxu0 %v986_v0 }
  0x1b   : > { %544 = vperm.xlu0 %951, %v496_v15   ;;  %529 = vperm.xlu1 %952, %v493_v16  }
  0x1f   : > { %534 = vperm.xlu0 %951, %v494_v17   ;;  %519 = vperm.xlu1 %952, %v491_v18  }
  0x20   : > { %907 = vmatmul.mubr.msk.bf16.gmra.mxu0 %vm373_vm1, %v954_v19  ;;  %v956_v19 = vld [vmem:[%s1174_s3] sm:$0xff]  }
  0x21   : > { %442 = vmatprep.mubr.bf16.mxu0 %v986_v0 }
  0x23   : > { %524 = vperm.xlu0 %951, %v492_v20   ;;  %509 = vperm.xlu1 %952, %v489_v21   ;;  %v957_v20 = vld [vmem:[%s1174_s3 + $0x8] sm:$0xff]   ;;  %v958_v21 = vld [vmem:[%s1174_s3 + $0x10] sm:$0xff]  }
  0x27   : > { %514 = vperm.xlu0 %951, %v490_v22   ;;  %499 = vperm.xlu1 %952, %v487_v23   ;;  %v959_v22 = vld [vmem:[%s1174_s3 + $0x18] sm:$0xff]   ;;  %v960_v23 = vld [vmem:[%s1174_s3 + $0x20] sm:$0xff]  }
  0x28   : > { %908 = vmatmul.mubr.msk.bf16.gmra.mxu0 %vm373_vm1, %v955_v24 }
  0x29   : > { %783 = vmatprep.mubr.bf16.mxu0 %v986_v0 }
  0x2b   : > { %504 = vperm.xlu0 %951, %v488_v25   ;;  %734 = vperm.xlu1 %952, %v730_v26  }
  0x2f   : > { %739 = vperm.xlu0 %951, %v731_v27  }
  0x8a   : > { %v358_v31 = vpop.permute.xlu0 %357  ;;  %v353_v37 = vpop.permute.xlu1 %352 }
  0x8e   : > { %v348_v35 = vpop.permute.xlu0 %347  ;;  %v338_v50 = vpop.permute.xlu1 %337 }
  0x92   : > { %v343_v43 = vpop.permute.xlu0 %342 }
  0xd8   : > { %v424_v28 = vpop.f32.mrf.mxu0 }
  0xd9   : > { %v425_v1 = vadd.f32 %v424_v28, %v338_v50 }
  0xda   : > { %v426_v29 = vpop.f32.mrf.mxu0 }
  0xdb   : > { %v427_v53 = vadd.f32 %v426_v29, %v338_v50  ;;  %v451_v11 = vmax.f32 %v425_v1, 5.0 }
  0xdc   : > { %v428_v30 = vpop.f32.mrf.mxu0 }
  0xdd   : > { %v429_v57 = vadd.f32 %v428_v30, %v343_v43  ;;  %v452_v3 = vmax.f32 %v427_v53, 5.0  ;;  %v461_v17 = vmin.f32 %v451_v11, 1.0 }
  0xde   : > { %v430_v32 = vpop.f32.mrf.mxu0 }
  0xdf   : > { %v431_v46 = vadd.f32 %v430_v32, %v343_v43  ;;  %v453_v6 = vmax.f32 %v429_v57, 5.0  ;;  %v462_v13 = vmin.f32 %v452_v3, 1.0 }
  0xe0   : > { %v434_v33 = vpop.f32.mrf.mxu0 }
  0xe1   : > { %v435_v51 = vadd.f32 %v434_v33, %v348_v35  ;;  %v454_v60 = vmax.f32 %v431_v46, 5.0  ;;  %v463_v14 = vmin.f32 %v453_v6, 1.0 }
  0xe2   : > { %v436_v34 = vpop.f32.mrf.mxu0 }
  0xe3   : > { %v437_v41 = vadd.f32 %v436_v34, %v348_v35  ;;  %v455_v2 = vmax.f32 %v435_v51, 5.0  ;;  %v464_v8 = vmin.f32 %v454_v60, 1.0  ;;  %v481_v18 = vpack.c.bf16 %v463_v14, %v461_v17  ;;  %v545_v34 = vpop.permute.xlu0 %544 }
  0xe4   : > { %v438_v36 = vpop.f32.mrf.mxu0 }
  0xe5   : > { %v439_v44 = vadd.f32 %v438_v36, %v353_v37  ;;  %v456_v54 = vmax.f32 %v437_v41, 5.0  ;;  %v465_v12 = vmin.f32 %v455_v2, 1.0  ;;  %v482_v16 = vpack.c.bf16 %v464_v8, %v462_v13  ;;  %v540_v36 = vpop.permute.xlu1 %539 }
  0xe6   : > { %v440_v38 = vpop.f32.mrf.mxu0 }
  0xe7   : > { %v441_v39 = vadd.f32 %v440_v38, %v353_v37  ;;  %v457_v58 = vmax.f32 %v439_v44, 5.0  ;;  %v466_v4 = vmin.f32 %v456_v54, 1.0 }
  0xe8   : > { %v444_v40 = vpop.f32.mrf.mxu0 }
  0xe9   : > { %v445_v42 = vadd.f32 %v444_v40, %v358_v31  ;;  %v458_v47 = vmax.f32 %v441_v39, 5.0  ;;  %v467_v7 = vmin.f32 %v457_v58, 1.0  ;;  %v535_v39 = vpop.permute.xlu0 %534  ;;  %v530_v41 = vpop.permute.xlu1 %529 }
  0xea   : > { %v446_v45 = vpop.f32.mrf.mxu0 }
  0xeb   : > { %v459_v48 = vmax.f32 %v445_v42, 5.0  ;;  %v447_v49 = vadd.f32 %v446_v45, %v358_v31  ;;  %v468_v61 = vmin.f32 %v458_v47, 1.0  ;;  %v483_v15 = vpack.c.bf16 %v467_v7, %v465_v12 }
  0xec   : > { %v448_v52 = vpop.f32.mrf.mxu0 }
  0xed   : > { %v469_v55 = vmin.f32 %v459_v48, 1.0  ;;  %v460_v56 = vmax.f32 %v447_v49, 5.0  ;;  %v484_v9 = vpack.c.bf16 %v468_v61, %v466_v4  ;;  %v525_v44 = vpop.permute.xlu0 %524  ;;  %v520_v48 = vpop.permute.xlu1 %519 }
  0xee   : > { %v449_v59 = vpop.f32.mrf.mxu0 }
  0xef   : > { %v485_v62 = vpack.c.bf16 %v469_v55, %v469_v55  ;;  %v470_v63 = vmin.f32 %v460_v56, 1.0 }
  0xf1   : > { %v486_v5 = vpack.c.bf16 %v470_v63, %v470_v63  ;;  %v590_v10 = vsel %vm588_vm2, %v485_v62, 0  ;;  %v515_v60 = vpop.permute.xlu0 %514  ;;  %v510_v3 = vpop.permute.xlu1 %509 }
  0xf3   : > { %914 = vmatprep.subr.msk.bf16.mxu1 %vm588_vm2, %v486_v5 }
  0xf4   : > { %606 = vmatpush1.bf16.msra.mxu1 %v590_v10 }
  0xf5   : > { %607 = vmatprep.subr.bf16.mxu1 %v484_v9 }
  0xf8   : > { %608 = vmatpush1.bf16.msra.mxu1 %v483_v15 }
  0xf9   : > { %609 = vmatprep.subr.bf16.mxu1 %v482_v16 }
  0xfc   : > { %610 = vmatpush1.bf16.msra.mxu1 %v481_v18 }
  0xff   : > { %915 = vmatmul.mubr.msk.bf16.vlgmr.msra.gmra.mxu1 %vm572_vm3, %v956_v19  ;;  %v505_v19 = vpop.permute.xlu0 %504 }
 0x100   : > { %637 = vmatprep.mubr.bf16.mxu1 %v986_v0 }
 0x107   : > { %916 = vmatmul.mubr.msk.bf16.gmra.mxu1 %vm572_vm3, %v957_v20 }
 0x108   : > { %647 = vmatprep.mubr.bf16.mxu1 %v986_v0 }
 0x10f   : > { %917 = vmatmul.mubr.msk.bf16.gmra.mxu1 %vm572_vm3, %v958_v21 }
 0x110   : > { %657 = vmatprep.mubr.bf16.mxu1 %v986_v0 }
 0x117   : > { %918 = vmatmul.mubr.msk.bf16.gmra.mxu1 %vm572_vm3, %v959_v22 }
 0x118   : > { %667 = vmatprep.mubr.bf16.mxu1 %v986_v0 }
 0x11f   : > { %919 = vmatmul.mubr.msk.bf16.gmra.mxu1 %vm572_vm3, %v960_v23 }
 0x1bf   : > { %v1142_v24 = vpop.f32.mrf.mxu1 }
 0x1c1   : > { %v1144_v25 = vpop.f32.mrf.mxu1 }
 0x1c3   : > { %v1146_v26 = vpop.f32.mrf.mxu1 }
 0x1c5   : > { %v635_v27 = vpop.f32.mrf.mxu1 }
 0x1c7   : > { %v1148_v28 = vpop.f32.mrf.mxu1 }
 0x1c9   : > { %v641_v29 = vpop.f32.mrf.mxu1 }
 0x1ca   : > { %v642_v15 = vadd.f32 %v641_v29, %v510_v3 }
 0x1cb   : > { %v643_v30 = vpop.f32.mrf.mxu1 }
 0x1cc   : > { %v644_v20 = vadd.f32 %v643_v30, %v515_v60  ;;  %v634_v30 = vadd.f32 %v1146_v26, %v505_v19 }
 0x1cd   : > { %v645_v31 = vpop.f32.mrf.mxu1 }
 0x1ce   : > { %v646_v4 = vadd.f32 %v645_v31, %v515_v60  ;;  %v636_v31 = vadd.f32 %v635_v27, %v505_v19 }
 0x1cf   : > { %v649_v32 = vpop.f32.mrf.mxu1 }
 0x1d0   : > { %v650_v12 = vadd.f32 %v649_v32, %v520_v48 }
 0x1d1   : > { %v651_v33 = vpop.f32.mrf.mxu1 }
 0x1d2   : > { %v652_v63 = vadd.f32 %v651_v33, %v520_v48  ;;  %v685_v33 = vmax.f32 %v646_v4, 5.0  ;;  %v686_v32 = vmax.f32 %v650_v12, 5.0 }
 0x1d3   : > { %v653_v0 = vpop.f32.mrf.mxu1 }
 0x1d4   : > { %v654_v5 = vadd.f32 %v653_v0, %v525_v44  ;;  %v687_v16 = vmax.f32 %v652_v63, 5.0 }
 0x1d5   : > { %v655_v35 = vpop.f32.mrf.mxu1 }
 0x1d6   : > { %v656_v53 = vadd.f32 %v655_v35, %v525_v44  ;;  %v688_v21 = vmax.f32 %v654_v5, 5.0  ;;  %v500_v35 = vpop.permute.xlu1 %499 }
 0x1d7   : > { %v659_v37 = vpop.f32.mrf.mxu1  ;;  %v632_v29 = vadd.f32 %v1144_v25, %v500_v35  ;;  %v680_v25 = vmax.f32 %v634_v30, 5.0 }
 0x1d8   : > { %v660_v61 = vadd.f32 %v659_v37, %v530_v41  ;;  %v689_v8 = vmax.f32 %v656_v53, 5.0 }
 0x1d9   : > { %v661_v38 = vpop.f32.mrf.mxu1 }
 0x1da   : > { %v662_v51 = vadd.f32 %v661_v38, %v530_v41  ;;  %v690_v13 = vmax.f32 %v660_v61, 5.0  ;;  %v709_v0 = vmin.f32 %v689_v8, 1.0  ;;  %v683_v38 = vmax.f32 %v642_v15, 5.0  ;;  %v735_v60 = vpop.permute.xlu1 %734 }
 0x1db   : > { %v663_v40 = vpop.f32.mrf.mxu1  ;;  %v708_v41 = vmin.f32 %v688_v21, 1.0 }
 0x1dc   : > { %v664_v54 = vadd.f32 %v663_v40, %v535_v39  ;;  %v691_v1 = vmax.f32 %v662_v51, 5.0  ;;  %v710_v37 = vmin.f32 %v690_v13, 1.0  ;;  %v684_v40 = vmax.f32 %v644_v20, 5.0 }
 0x1dd   : > { %v665_v42 = vpop.f32.mrf.mxu1  ;;  %v703_v48 = vmin.f32 %v683_v38, 1.0 }
 0x1de   : > { %v666_v46 = vadd.f32 %v665_v42, %v535_v39  ;;  %v692_v6 = vmax.f32 %v664_v54, 5.0  ;;  %v711_v17 = vmin.f32 %v691_v1, 1.0  ;;  %v707_v39 = vmin.f32 %v687_v16, 1.0 }
 0x1df   : > { %v669_v43 = vpop.f32.mrf.mxu1  ;;  %v681_v42 = vmax.f32 %v636_v31, 5.0 }
 0x1e0   : > { %v670_v49 = vadd.f32 %v669_v43, %v540_v36  ;;  %v693_v56 = vmax.f32 %v666_v46, 5.0  ;;  %v712_v22 = vmin.f32 %v692_v6, 1.0  ;;  %v705_v43 = vmin.f32 %v685_v33, 1.0 }
 0x1e1   : > { %v671_v45 = vpop.f32.mrf.mxu1  ;;  %v725_v44 = vpack.c.bf16 %v709_v0, %v707_v39  ;;  %v701_v51 = vmin.f32 %v681_v42, 1.0 }
 0x1e2   : > { %v672_v47 = vadd.f32 %v671_v45, %v540_v36  ;;  %v694_v62 = vmax.f32 %v670_v49, 5.0  ;;  %v713_v9 = vmin.f32 %v693_v56, 1.0  ;;  %v640_v36 = vadd.f32 %v1148_v28, %v510_v3  ;;  %v740_v3 = vpop.permute.xlu0 %739 }
 0x1e3   : > { %v673_v50 = vpop.f32.mrf.mxu1  ;;  %v726_v27 = vpack.c.bf16 %v712_v22, %v710_v37  ;;  %v630_v45 = vadd.f32 %v1142_v24, %v500_v35  ;;  %v706_v28 = vmin.f32 %v686_v32, 1.0  ;;  %v704_v49 = vmin.f32 %v684_v40, 1.0 }
 0x1e4   : > { %v674_v52 = vadd.f32 %v673_v50, %v545_v34  ;;  %v695_v57 = vmax.f32 %v672_v47, 5.0  ;;  %v714_v14 = vmin.f32 %v694_v62, 1.0  ;;  %v682_v46 = vmax.f32 %v640_v36, 5.0 }
 0x1e5   : > { %v675_v55 = vpop.f32.mrf.mxu1  ;;  %v679_v47 = vmax.f32 %v632_v29, 5.0  ;;  %v724_v50 = vpack.c.bf16 %v708_v41, %v706_v28  ;;  %v678_v26 = vmax.f32 %v630_v45, 5.0 }
 0x1e6   : > { %v696_v58 = vmax.f32 %v674_v52, 5.0  ;;  %v676_v59 = vadd.f32 %v675_v55, %v545_v34  ;;  %v715_v10 = vmin.f32 %v695_v57, 1.0  ;;  %v727_v34 = vpack.c.bf16 %v713_v9, %v711_v17 }
 0x1e7   : > { %v723_v52 = vpack.c.bf16 %v705_v43, %v703_v48  ;;  %v702_v53 = vmin.f32 %v682_v46, 1.0  ;;  %v699_v54 = vmin.f32 %v679_v47, 1.0  ;;  %v700_v55 = vmin.f32 %v680_v25, 1.0 }
 0x1e8   : > { %v697_v2 = vmax.f32 %v676_v59, 5.0  ;;  %v716_v7 = vmin.f32 %v696_v58, 1.0  ;;  %v698_v24 = vmin.f32 %v678_v26, 1.0  ;;  %v961_v59 = vld [vmem:[%s1176_s5] sm:$0x1f]  }
 0x1e9   : > { %v722_v56 = vpack.c.bf16 %v704_v49, %v702_v53  ;;  %v721_v57 = vpack.c.bf16 %v701_v51, %v699_v54 }
 0x1ea   : > { %v717_v11 = vmin.f32 %v697_v2, 1.0  ;;  %v728_v23 = vpack.c.bf16 %v716_v7, %v714_v14  ;;  %v720_v58 = vpack.c.bf16 %v700_v55, %v698_v24 }
 0x1ec   : > { %v729_v18 = vpack.c.bf16 %v717_v11, %v715_v10 }
 0x1ee   : > { %757 = vmatprep.subr.bf16.mxu0 %v729_v18 }
 0x1ef   : > { %758 = vmatpush1.bf16.msra.mxu0 %v728_v23 }
 0x1f0   : > { %759 = vmatprep.subr.bf16.mxu0 %v727_v34 }
 0x1f3   : > { %760 = vmatpush1.bf16.msra.mxu0 %v726_v27 }
 0x1f4   : > { %761 = vmatprep.subr.bf16.mxu0 %v725_v44 }
 0x1f7   : > { %762 = vmatpush1.bf16.msra.mxu0 %v724_v50 }
 0x1f8   : > { %763 = vmatprep.subr.bf16.mxu0 %v723_v52 }
 0x1fb   : > { %764 = vmatpush1.bf16.msra.mxu0 %v722_v56 }
 0x1fc   : > { %765 = vmatprep.subr.bf16.mxu0 %v721_v57 }
 0x1ff   : > { %766 = vmatpush1.bf16.msra.mxu0 %v720_v58 }
 0x202   : > { %921 = vmatmul.mubr.msk.bf16.vlgmr.msra.gmra.mxu0 %vm747_vm4, %v961_v59 }
 0x2c2   : > { %v785_v61 = vpop.f32.mrf.mxu0 }
 0x2c3   : > { %v786_v62 = vadd.f32 %v785_v61, %v735_v60 }
 0x2c4   : > { %v787_v63 = vpop.f32.mrf.mxu0 }
 0x2c5   : > { %v794_v1 = vmax.f32 %v786_v62, 5.0  ;;  %v788_v2 = vadd.f32 %v787_v63, %v735_v60 }
 0x2c6   : > { %v789_v4 = vpop.f32.mrf.mxu0 }
 0x2c7   : > { %v798_v5 = vmin.f32 %v794_v1, 1.0  ;;  %v795_v6 = vmax.f32 %v788_v2, 5.0  ;;  %v790_v7 = vadd.f32 %v789_v4, %v740_v3 }
 0x2c8   : > { %v791_v8 = vpop.f32.mrf.mxu0 }
 0x2c9   : > { %802 = vst [vmem:[%s316_s8] sm:$0xff] %v798_v5  ;;  %v799_v9 = vmin.f32 %v795_v6, 1.0  ;;  %v796_v10 = vmax.f32 %v790_v7, 5.0  ;;  %v792_v11 = vadd.f32 %v791_v8, %v740_v3 }
 0x2cb   : > { %803 = vst [vmem:[%s316_s8 + $0x8] sm:$0xff] %v799_v9  ;;  %v800_v12 = vmin.f32 %v796_v10, 1.0  ;;  %v797_v13 = vmax.f32 %v792_v11, 5.0 }
 0x2cd   : > { %804 = vst [vmem:[%s316_s8 + $0x10] sm:$0x3] %v800_v12  ;;  %v801_v14 = vmin.f32 %v797_v13, 1.0 }
 0x2cf   : > { %805 = vst [vmem:[%s316_s8 + $0x18] sm:$0x3] %v801_v14 }
 0x2d0 PF: > { %s17_s26 = sadd.s32 1, %s984_s26   ;;  %s1179_s24 = smov %s980_s25 }
 0x2d1   : > { %p14_p5 = scmp.ge.s32.totalorder %s17_s26, 4   ;;  %s1180_s25 = smov %s1182_s27 }
 0x2d3   :  { %16 = sbr.rel (!%p14_p5) target bundleno = 2 (0x2), region = 78 }

</bundles_post_ra>
